<compile_context>
chip_gen: v5e
topology: v5e:2x2
jax: 0.10.0
libtpu: 0.0.40
codegen_flags: <defaults>
</compile_context>

<pallas_src>
import functools

import jax
import jax.numpy as jnp
from jax.experimental import pallas as pl
from jax.experimental.pallas import tpu as pltpu


def _round_up(v: int, m: int) -> int:
    return ((v + m - 1) // m) * m


def _cdiv(a: int, b: int) -> int:
    return -(-a // b)


@functools.lru_cache(maxsize=1)
def _vmem_capacity_bytes() -> int:
    """Physical VMEM per TensorCore; conservative fallback if query fails."""
    try:
        return int(pltpu.get_tpu_info().vmem_capacity_bytes)
    except Exception:
        return 64 * 1024 * 1024  # v7x per-TC size (safe lower bound)


def mlp_kernel(x_ref, w1_ref, b1_ref, w2_ref, b2_ref, o_ref):
    # lin1: [TN, Fp] @ [Fp, Hp] -> f32 accumulate on the MXU.
    h = jnp.dot(x_ref[...], w1_ref[...], preferred_element_type=jnp.float32)
    # Bias + ReLU + downcast fused: only the compute-dtype hidden tile is
    # materialized in VMEM (halves the [TN, Hp] intermediate's vst/vld traffic).
    h = jnp.maximum(h + b1_ref[...], 0.0).astype(w2_ref.dtype)
    # Dropout(training=False) is identity.
    # lin2: [TN, Hp] @ [Hp, Cp] -> f32 accumulate.
    out = jnp.dot(h, w2_ref[...], preferred_element_type=jnp.float32)
    o_ref[...] = (out + b2_ref[...]).astype(o_ref.dtype)
    # TODO(synk): add a K grid axis + f32 VMEM accumulator (init at k==0,
    # bias/ReLU/lin2 finalize at k==last under pl.when) once resident weights
    # exceed ~40 MiB (v7x) / ~90 MiB (v5e/v6e).


def prepare_params(w1, b1, w2, b2, *, compute_dtype=jnp.bfloat16):
    """Pad/cast weights once, outside the per-call path (they are static).

    Feature/hidden/class dims are zero-padded to the 128-lane width, which is
    mathematically exact for x @ W + b.
    """
    f, h = w1.shape
    h2, c = w2.shape
    assert h2 == h
    f_p = _round_up(f, 128)
    h_p = _round_up(h, 128)
    c_p = _round_up(c, 128)
    # TODO(synk): on v6e/v7x with large (non-toy) H/C, align to 256 to match
    # the 2x256^2 MXU; 128 is native on v5e and exact for these toy shapes.
    w1_p = jnp.pad(w1, ((0, f_p - f), (0, h_p - h))).astype(compute_dtype)
    b1_p = jnp.pad(b1.reshape(1, -1), ((0, 0), (0, h_p - h))).astype(jnp.float32)
    w2_p = jnp.pad(w2, ((0, h_p - h), (0, c_p - c))).astype(compute_dtype)
    b2_p = jnp.pad(b2.reshape(1, -1), ((0, 0), (0, c_p - c))).astype(jnp.float32)
    return w1_p, b1_p, w2_p, b2_p


@functools.partial(jax.jit,
                   static_argnames=("num_classes", "block_n", "compute_dtype"))
def mlp_forward(x, w1_p, b1_p, w2_p, b2_p, *, num_classes,
                block_n=None, compute_dtype=jnp.bfloat16):
    n, f = x.shape
    f_p, h_p = w1_p.shape
    c_p = w2_p.shape[1]

    vmem_cap = _vmem_capacity_bytes()
    # Leave ~20% headroom for compiler scratch / semaphores / pipeline buffers.
    vmem_limit = int(0.8 * vmem_cap)
    if block_n is None:
        # Fatter tiles on 128-MiB chips (v5e/v6e); 512 on v7x's 64 MiB/TC.
        block_n = 1024 if vmem_cap >= 96 * 1024 * 1024 else 512

    # Adaptive row tile: smallest tile count that fits block_n, so padding
    # waste is < one (small) tile instead of up to a full block_n.
    itemsize = jnp.dtype(compute_dtype).itemsize
    row_align = 32 if itemsize == 1 else (16 if itemsize == 2 else 8)
    n_tiles = max(1, _cdiv(n, block_n))
    tn = _round_up(_cdiv(n, n_tiles), row_align)
    n_p = _round_up(n, tn)

    # Only x is padded/cast per call (weights were prepared once).
    x_p = jnp.pad(x, ((0, n_p - n), (0, f_p - f))).astype(compute_dtype)

    grid = (n_p // tn,)

    cost = pl.CostEstimate(
        flops=2 * n_p * (f_p * h_p + h_p * c_p),
        transcendentals=0,
        bytes_accessed=int(n_p * f_p * itemsize
                           + (f_p * h_p + h_p * c_p) * itemsize
                           + (h_p + c_p) * 4
                           + n_p * c_p * 4),
    )

    # Weights/biases: constant index_map -> VMEM-resident; Buffered(1) avoids
    # allocating a useless second buffer for them.
    resident = dict(pipeline_mode=pl.Buffered(1))

    out_p = pl.pallas_call(
        mlp_kernel,
        out_shape=jax.ShapeDtypeStruct((n_p, c_p), jnp.float32),
        grid_spec=pltpu.PrefetchScalarGridSpec(
            num_scalar_prefetch=0,
            grid=grid,
            in_specs=[
                # Row tile of x, double-buffered over the grid.
                pl.BlockSpec((tn, f_p), lambda i: (i, 0)),
                pl.BlockSpec((f_p, h_p), lambda i: (0, 0), **resident),
                pl.BlockSpec((1, h_p), lambda i: (0, 0), **resident),
                pl.BlockSpec((h_p, c_p), lambda i: (0, 0), **resident),
                pl.BlockSpec((1, c_p), lambda i: (0, 0), **resident),
            ],
            out_specs=pl.BlockSpec((tn, c_p), lambda i: (i, 0)),
        ),
        compiler_params=pltpu.CompilerParams(
            # Row axis is independent -> shard across TCs on v7x megacore.
            dimension_semantics=("parallel",),
            vmem_limit_bytes=vmem_limit,
        ),
        cost_estimate=cost,
    )(x_p, w1_p, b1_p, w2_p, b2_p)

    return out_p[:n, :num_classes]


def init_params(key, num_features, hidden_channels, num_classes):
    # Deterministic init mimicking torch.nn.Linear (uniform(-1/sqrt(fan_in), ...)).
    k1, k2, k3, k4 = jax.random.split(key, 4)
    bound1 = 1.0 / jnp.sqrt(num_features)
    bound2 = 1.0 / jnp.sqrt(hidden_channels)
    w1 = jax.random.uniform(k1, (num_features, hidden_channels),
                            minval=-bound1, maxval=bound1, dtype=jnp.float32)
    b1 = jax.random.uniform(k2, (1, hidden_channels),
                            minval=-bound1, maxval=bound1, dtype=jnp.float32)
    w2 = jax.random.uniform(k3, (hidden_channels, num_classes),
                            minval=-bound2, maxval=bound2, dtype=jnp.float32)
    b2 = jax.random.uniform(k4, (1, num_classes),
                            minval=-bound2, maxval=bound2, dtype=jnp.float32)
    return w1, b1, w2, b2


if __name__ == "__main__":
    # Small synthetic graph-node features: N=8 nodes, F=16 features,
    # hidden=32, num_classes=4 (same module semantics as the PyTorch MLP).
    N, F_IN, HID, NUM_CLASSES = 8, 16, 32, 4

    key = jax.random.PRNGKey(0)
    kx, kp = jax.random.split(key)
    x = jax.random.normal(kx, (N, F_IN), dtype=jnp.float32)
    w1, b1, w2, b2 = init_params(kp, F_IN, HID, NUM_CLASSES)

    # Pad/cast weights once (static across forward calls).
    w1_p, b1_p, w2_p, b2_p = prepare_params(w1, b1, w2, b2)

    out = mlp_forward(x, w1_p, b1_p, w2_p, b2_p, num_classes=NUM_CLASSES)
    out = jax.block_until_ready(out)
    assert out.shape == (N, NUM_CLASSES)
    assert out.dtype == jnp.float32

    # Pure-JAX reference mirroring the kernel's dtype choices
    # (bf16 matmul operands, f32 accumulation/elementwise; dropout identity).
    bf16 = jnp.bfloat16
    ref_h = jnp.maximum(
        jnp.dot(x.astype(bf16), w1.astype(bf16),
                preferred_element_type=jnp.float32) + b1, 0.0).astype(bf16)
    ref = jnp.dot(ref_h, w2.astype(bf16),
                  preferred_element_type=jnp.float32) + b2
    assert jnp.allclose(out, ref, atol=1e-2, rtol=1e-2), (
        f"max abs err {jnp.max(jnp.abs(out - ref))}")

    # Looser sanity check against the full-f32 math as well.
    ref_f32 = jnp.maximum(x @ w1 + b1, 0.0) @ w2 + b2
    assert jnp.allclose(out, ref_f32, atol=5e-2, rtol=5e-2)

    print("KERNEL_OK")
</pallas_src>

<mosaic_0001>
module attributes {stable_mosaic.version = 11 : i64} {
  func.func @mlp_kernel(%arg0: i32, %arg1: memref<16x128xbf16, #tpu.memory_space<vmem>>, %arg2: memref<128x128xbf16, #tpu.memory_space<vmem>>, %arg3: memref<1x128xf32, #tpu.memory_space<vmem>>, %arg4: memref<128x128xbf16, #tpu.memory_space<vmem>>, %arg5: memref<1x128xf32, #tpu.memory_space<vmem>>, %arg6: memref<16x128xf32, #tpu.memory_space<vmem>>) attributes {dimension_semantics = [#tpu.dimension_semantics<parallel>], iteration_bounds = array<i64: 1>, scalar_prefetch = 0 : i64, scratch_operands = 0 : i64, tpu.core_type = #tpu.core_type<tc>, window_params = [{transform_indices = @transform_0, window_bounds = array<i64: 16, 128>}, {pipeline_mode = #tpu.pipeline_mode<synchronous>, transform_indices = @transform_1, window_bounds = array<i64: 128, 128>}, {pipeline_mode = #tpu.pipeline_mode<synchronous>, transform_indices = @transform_2, window_bounds = array<i64: 1, 128>}, {pipeline_mode = #tpu.pipeline_mode<synchronous>, transform_indices = @transform_3, window_bounds = array<i64: 128, 128>}, {pipeline_mode = #tpu.pipeline_mode<synchronous>, transform_indices = @transform_4, window_bounds = array<i64: 1, 128>}, {transform_indices = @transform_5, window_bounds = array<i64: 16, 128>}]} {
    %c0 = arith.constant 0 : index
    %c0_0 = arith.constant 0 : index
    %0 = vector.load %arg1[%c0, %c0_0] : memref<16x128xbf16, #tpu.memory_space<vmem>>, vector<16x128xbf16>
    %c0_1 = arith.constant 0 : index
    %c0_2 = arith.constant 0 : index
    %1 = vector.load %arg2[%c0_1, %c0_2] : memref<128x128xbf16, #tpu.memory_space<vmem>>, vector<128x128xbf16>
    %cst = arith.constant dense<0.000000e+00> : vector<16x128xf32>
    %2 = tpu.matmul %0, %1, %cst {dimension_numbers = #tpu.dot_dimension_numbers<[1], [0], [0], [1], [0, 0, 1, 1], [], []>} : vector<16x128xbf16>, vector<128x128xbf16>, vector<16x128xf32> -> vector<16x128xf32>
    %c0_3 = arith.constant 0 : index
    %c0_4 = arith.constant 0 : index
    %3 = vector.load %arg3[%c0_3, %c0_4] : memref<1x128xf32, #tpu.memory_space<vmem>>, vector<1x128xf32>
    %4 = vector.broadcast %3 : vector<1x128xf32> to vector<16x128xf32>
    %5 = arith.addf %2, %4 : vector<16x128xf32>
    %cst_5 = arith.constant 0.000000e+00 : f32
    %6 = vector.broadcast %cst_5 : f32 to vector<16x128xf32>
    %7 = arith.maximumf %5, %6 : vector<16x128xf32>
    %8 = arith.truncf %7 : vector<16x128xf32> to vector<16x128xbf16>
    %c0_6 = arith.constant 0 : index
    %c0_7 = arith.constant 0 : index
    %9 = vector.load %arg4[%c0_6, %c0_7] : memref<128x128xbf16, #tpu.memory_space<vmem>>, vector<128x128xbf16>
    %cst_8 = arith.constant dense<0.000000e+00> : vector<16x128xf32>
    %10 = tpu.matmul %8, %9, %cst_8 {dimension_numbers = #tpu.dot_dimension_numbers<[1], [0], [0], [1], [0, 0, 1, 1], [], []>} : vector<16x128xbf16>, vector<128x128xbf16>, vector<16x128xf32> -> vector<16x128xf32>
    %c0_9 = arith.constant 0 : index
    %c0_10 = arith.constant 0 : index
    %11 = vector.load %arg5[%c0_9, %c0_10] : memref<1x128xf32, #tpu.memory_space<vmem>>, vector<1x128xf32>
    %12 = vector.broadcast %11 : vector<1x128xf32> to vector<16x128xf32>
    %13 = arith.addf %10, %12 : vector<16x128xf32>
    %c0_11 = arith.constant 0 : index
    %c0_12 = arith.constant 0 : index
    %14 = vector.load %arg6[%c0_11, %c0_12] : memref<16x128xf32, #tpu.memory_space<vmem>>, vector<16x128xf32>
    tpu.vector_store %arg6[%c0_11, %c0_12], %13 {strides = array<i32>} : memref<16x128xf32, #tpu.memory_space<vmem>>, vector<16x128xf32>,
    return
  }
  func.func @transform_0(%arg0: i32) -> (i32, i32) {
    %c0_i32 = arith.constant 0 : i32
    %c0_i32_0 = arith.constant 0 : i32
    return %arg0, %c0_i32 : i32, i32
  }
  func.func @transform_1(%arg0: i32) -> (i32, i32) {
    %c0_i32 = arith.constant 0 : i32
    %c0_i32_0 = arith.constant 0 : i32
    %c0_i32_1 = arith.constant 0 : i32
    return %c0_i32, %c0_i32_0 : i32, i32
  }
  func.func @transform_2(%arg0: i32) -> (i32, i32) {
    %c0_i32 = arith.constant 0 : i32
    %c0_i32_0 = arith.constant 0 : i32
    %c0_i32_1 = arith.constant 0 : i32
    return %c0_i32, %c0_i32_0 : i32, i32
  }
  func.func @transform_3(%arg0: i32) -> (i32, i32) {
    %c0_i32 = arith.constant 0 : i32
    %c0_i32_0 = arith.constant 0 : i32
    %c0_i32_1 = arith.constant 0 : i32
    return %c0_i32, %c0_i32_0 : i32, i32
  }
  func.func @transform_4(%arg0: i32) -> (i32, i32) {
    %c0_i32 = arith.constant 0 : i32
    %c0_i32_0 = arith.constant 0 : i32
    %c0_i32_1 = arith.constant 0 : i32
    return %c0_i32, %c0_i32_0 : i32, i32
  }
  func.func @transform_5(%arg0: i32) -> (i32, i32) {
    %c0_i32 = arith.constant 0 : i32
    %c0_i32_0 = arith.constant 0 : i32
    return %arg0, %c0_i32 : i32, i32
  }
}

</mosaic_0001>

<bundles_post_ra>
// kernel: mlp_forward.1
= control target key start
LH: loop header
LB: loop body
LE: loop exit
PB: predicated region body
PF: predicated region fallthrough
CT: control target
= control target key end

     0   :  { %10 = vsyncpa [#allocation3], 0  ;;  %s433_s0 = inlined_call_operand.vmem [shape: bf16[16,128], index: 0, kind: input, shape index: {}]   ;;  %s434_s1 = inlined_call_operand.hbm [shape: bf16[128,128], index: 1, kind: input, shape index: {}]   ;;  %s435_s2 = inlined_call_operand.vmem [shape: f32[1,128], index: 2, kind: input, shape index: {}]   ;;  %s436_s3 = inlined_call_operand.hbm [shape: bf16[128,128], index: 3, kind: input, shape index: {}]   ;;  %s437_s4 = inlined_call_operand.vmem [shape: f32[1,128], index: 4, kind: input, shape index: {}]   ;;  %s438_s5 = inlined_call_operand.vmem [shape: f32[16,128], index: 5, kind: output, shape index: {}]  }
   0x1   :  { %s18_s20 = sshll.u32 %s434_s1, 4  ;;  %s19_s20 = int_to_ptr.hbm [resolvable:$true] %s18_s20 }
   0x2   :  { %11 = vsyncpa [#allocation5], 0  ;;  %s378_s21 = smov [#allocation2]   ;;  %s33_s25 = sshll.u32 %s436_s3, 4  ;;  %s34_s25 = int_to_ptr.hbm [resolvable:$true] %s33_s25 }
   0x3   :  { %s20_s22 = sshll.u32 %s378_s21, 4  ;;  %s379_s26 = smov 64   ;;  %s21_s22 = int_to_ptr.vmem [resolvable:$true] %s20_s22 }
   0x4   :  { %s380_s27 = smov 4   ;;  %s381_s28 = smov [#allocation4]  }
   0x5   :  { %26 = dma.hbm_to_vmem [thread:$0]  %s19_s20, 1024, %s21_s22, [#allocation3], %s379_s26, %s379_s26, %s380_s27  }
   0x6   :  { %s35_s29 = sshll.u32 %s381_s28, 4  ;;  %s36_s29 = int_to_ptr.vmem [resolvable:$true] %s35_s29 }
   0x7   :  { %41 = dma.hbm_to_vmem [thread:$0]  %s34_s25, 1024, %s36_s29, [#allocation5], %s379_s26, %s379_s26, %s380_s27  }
   0x8   :  { %374 = dma.done.wait [#allocation3], 1024  }
   0x9   :  { %375 = vsyncadd [#allocation3], 4294966272 }
   0xa   :  { %376 = dma.done.wait [#allocation5], 1024  }
   0xb   :  { %377 = vsyncadd [#allocation5], 4294966272  ;;  %v311_v0 = vld [vmem:[#allocation2 + $0x38] sm:$0xff]  ;;  %v310_v1 = vld [vmem:[#allocation2 + $0x30] sm:$0xff] }
   0xc   :  { %128 = vmatpush.bf16.msra.mxu0 %v311_v0  ;;  %v319_v2 = vld [vmem:[#allocation4 + $0x38] sm:$0xff]  ;;  %v318_v3 = vld [vmem:[#allocation4 + $0x30] sm:$0xff]  ;;  %v309_v4 = vld [vmem:[#allocation2 + $0x28] sm:$0xff] }
   0xd   :  { %213 = vmatpush.bf16.msra.mxu1 %v319_v2  ;;  %v317_v5 = vld [vmem:[#allocation4 + $0x28] sm:$0xff]  ;;  %v308_v6 = vld [vmem:[#allocation2 + $0x20] sm:$0xff]  ;;  %v307_v8 = vld [vmem:[#allocation2 + $0x18] sm:$0xff] }
   0xe   :  { %v316_v7 = vld [vmem:[#allocation4 + $0x20] sm:$0xff]  ;;  %v306_v9 = vld [vmem:[#allocation2 + $0x10] sm:$0xff]  ;;  %v305_v10 = vld [vmem:[#allocation2 + $0x8] sm:$0xff] }
   0xf   :  { %v304_v11 = vld [vmem:[#allocation2] sm:$0xff]  ;;  %v315_v13 = vld [vmem:[#allocation4 + $0x18] sm:$0xff]  ;;  %v314_v14 = vld [vmem:[#allocation4 + $0x10] sm:$0xff] }
  0x10   :  { %129 = vmatpush.bf16.msra.mxu0 %v310_v1  ;;  %v303_v12 = vld [vmem:[%s433_s0] sm:$0xff]  ;;  %v313_v15 = vld [vmem:[#allocation4 + $0x8] sm:$0xff] }
  0x11   :  { %214 = vmatpush.bf16.msra.mxu1 %v318_v3  ;;  %v312_v16 = vld [vmem:[#allocation4] sm:$0xff] }
  0x12   :  { %v324_v18 = vld [vmem:[%s435_s2] ss:$0 sm:$0xff] }
  0x13   :  { %v325_v25 = vld [vmem:[%s437_s4] ss:$0 sm:$0xff] }
  0x14   :  { %130 = vmatpush.bf16.msra.mxu0 %v309_v4 }
  0x15   :  { %215 = vmatpush.bf16.msra.mxu1 %v317_v5 }
  0x18   :  { %131 = vmatpush.bf16.msra.mxu0 %v308_v6 }
  0x19   :  { %216 = vmatpush.bf16.msra.mxu1 %v316_v7 }
  0x1c   :  { %132 = vmatpush.bf16.msra.mxu0 %v307_v8 }
  0x1d   :  { %217 = vmatpush.bf16.msra.mxu1 %v315_v13 }
  0x20   :  { %133 = vmatpush.bf16.msra.mxu0 %v306_v9 }
  0x21   :  { %218 = vmatpush.bf16.msra.mxu1 %v314_v14 }
  0x24   :  { %134 = vmatpush.bf16.msra.mxu0 %v305_v10 }
  0x25   :  { %219 = vmatpush.bf16.msra.mxu1 %v313_v15 }
  0x28   :  { %135 = vmatpush.bf16.msra.mxu0 %v304_v11 }
  0x29   :  { %220 = vmatpush.bf16.msra.mxu1 %v312_v16 }
  0x2b   :  { %136 = vmatmul.bf16.vlgmr.msra.gmra.mxu0 %v303_v12 }
  0xa8   :  { %v137_v17 = vpop.f32.mrf.mxu0 }
  0xa9   :  { %v138_v19 = vadd.f32 %v324_v18, %v137_v17 }
  0xab   :  { %v142_v22 = vmax.f32 %v138_v19, 0.0 }
  0xb0   :  { %v139_v20 = vpop.f32.mrf.mxu0 }
  0xb1   :  { %v140_v21 = vadd.f32 %v324_v18, %v139_v20 }
  0xb3   :  { %v143_v23 = vmax.f32 %v140_v21, 0.0 }
  0xb5   :  { %v144_v24 = vpack.c.bf16 %v143_v23, %v142_v22 }
  0xb7   :  { %221 = vmatmul.bf16.vlgmr.msra.gmra.mxu1 %v144_v24 }
 0x134   :  { %v222_v26 = vpop.f32.mrf.mxu1 }
 0x135   :  { %v223_v27 = vadd.f32 %v325_v25, %v222_v26 }
 0x137   :  { %227 = vst [vmem:[%s438_s5] sm:$0xff] %v223_v27 }
 0x13c   :  { %v224_v28 = vpop.f32.mrf.mxu1 }
 0x13d   :  { %v225_v29 = vadd.f32 %v325_v25, %v224_v28 }
 0x13f   :  { %228 = vst [vmem:[%s438_s5 + $0x8] sm:$0xff] %v225_v29 }
 0x140   :  { %233 = vsyncpa [#allocation3], 1 }
 0x141   :  { %234 = vsyncpa [#allocation5], 1 }

</bundles_post_ra>
